<compile_context>
chip_gen: v7x
topology: tpu7x:2x2x1
jax: 0.10.0
libtpu: 0.0.40
codegen_flags: <defaults>
</compile_context>

<pallas_src>
import functools
import math

import jax
import jax.numpy as jnp
from jax.experimental import pallas as pl
from jax.experimental.pallas import tpu as pltpu

_VMEM_LIMIT = 48 * 1024 * 1024  # v7x-safe (64 MiB physical VMEM); ample on v5e/v6e


def _tile(dim, target):
    """Largest clean tile: `target` if it divides `dim`, else the full dim."""
    if dim <= target:
        return dim
    if dim % target == 0:
        return target
    return dim


def _apply_act(y, act):
    if act == "gelu_erf":        # torch nn.GELU() default (exact erf)
        return 0.5 * y * (1.0 + jax.lax.erf(y * (1.0 / math.sqrt(2.0))))
    if act == "gelu_tanh":       # DiT MLP uses GELU(approximate='tanh')
        c = math.sqrt(2.0 / math.pi)
        return 0.5 * y * (1.0 + jnp.tanh(c * (y + 0.044715 * y * y * y)))
    if act == "silu":
        return y * jax.nn.sigmoid(y)
    return y


# ----------------------------------------------------------------------------
# Generic tiled linear: y = act(x @ w + b), bf16 MXU inputs, f32 accumulate
# ----------------------------------------------------------------------------
def _linear_kernel(x_ref, w_ref, b_ref, o_ref, acc_ref, *, act):
    k = pl.program_id(2)

    @pl.when(k == 0)
    def _():
        acc_ref[...] = jnp.zeros_like(acc_ref)

    acc_ref[...] += jnp.dot(x_ref[...].astype(jnp.bfloat16), w_ref[...],
                            preferred_element_type=jnp.float32)

    @pl.when(k == pl.num_programs(2) - 1)
    def _():
        y = _apply_act(acc_ref[...] + b_ref[...], act)
        o_ref[...] = y.astype(o_ref.dtype)


def pallas_linear(x, w, b, act="none", out_dtype=jnp.float32,
                  tm=256, tn=512, tk=512):
    M, K = x.shape
    _, N = w.shape
    tm, tn, tk = _tile(M, tm), _tile(N, tn), _tile(K, tk)
    grid = (M // tm, N // tn, K // tk)
    cost = pl.CostEstimate(
        flops=2 * M * N * K,
        transcendentals=(M * N if act != "none" else 0),
        bytes_accessed=int(M * K * x.dtype.itemsize + K * N * w.dtype.itemsize
                           + M * N * jnp.dtype(out_dtype).itemsize))
    return pl.pallas_call(
        functools.partial(_linear_kernel, act=act),
        grid=grid,
        in_specs=[
            pl.BlockSpec((tm, tk), lambda i, j, k: (i, k)),
            pl.BlockSpec((tk, tn), lambda i, j, k: (k, j)),
            pl.BlockSpec((1, tn), lambda i, j, k: (0, j)),
        ],
        out_specs=pl.BlockSpec((tm, tn), lambda i, j, k: (i, j)),
        out_shape=jax.ShapeDtypeStruct((M, N), out_dtype),
        scratch_shapes=[pltpu.VMEM((tm, tn), jnp.float32)],
        compiler_params=pltpu.CompilerParams(
            dimension_semantics=("parallel", "parallel", "arbitrary"),
            vmem_limit_bytes=_VMEM_LIMIT),
        cost_estimate=cost,
    )(x, w, b.reshape(1, N))


# ----------------------------------------------------------------------------
# Fused LayerNorm + adaLN modulate + matmul (+ optional activation)
#   out = act( (LN(x)*(1+scale)+shift) @ w + b )        (B,T,D) -> (B,T,N)
# LN+modulate result is cached in a bf16 VMEM scratch and reused across N tiles.
# ----------------------------------------------------------------------------
def _ln_mod_mm_kernel(x_ref, sh_ref, sc_ref, w_ref, b_ref, o_ref, xm_ref,
                      *, eps, act):
    n = pl.program_id(2)

    @pl.when(n == 0)
    def _():
        x = x_ref[0]                                              # (tr, D) f32
        mu = jnp.mean(x, axis=-1, keepdims=True)
        var = jnp.mean(jnp.square(x - mu), axis=-1, keepdims=True)
        xn = (x - mu) * jax.lax.rsqrt(var + eps)
        xm_ref[...] = (xn * (1.0 + sc_ref[0]) + sh_ref[0]).astype(xm_ref.dtype)

    y = jnp.dot(xm_ref[...], w_ref[...],
                preferred_element_type=jnp.float32) + b_ref[...]
    o_ref[0] = _apply_act(y, act).astype(o_ref.dtype)


def pallas_ln_mod_matmul(x, shift, scale, w, b, act="none",
                         out_dtype=jnp.bfloat16, eps=1e-6, tr=256, tn=512):
    B, T, D = x.shape
    _, N = w.shape
    tr, tn = _tile(T, tr), _tile(N, tn)
    grid = (B, T // tr, N // tn)
    cost = pl.CostEstimate(
        flops=2 * B * T * D * N,
        transcendentals=B * T,
        bytes_accessed=int(B * T * D * 4 + D * N * w.dtype.itemsize
                           + B * T * N * jnp.dtype(out_dtype).itemsize))
    return pl.pallas_call(
        functools.partial(_ln_mod_mm_kernel, eps=eps, act=act),
        grid=grid,
        in_specs=[
            pl.BlockSpec((1, tr, D), lambda b_, i, n: (b_, i, 0)),
            pl.BlockSpec((1, 1, D), lambda b_, i, n: (b_, 0, 0)),
            pl.BlockSpec((1, 1, D), lambda b_, i, n: (b_, 0, 0)),
            pl.BlockSpec((D, tn), lambda b_, i, n: (0, n)),
            pl.BlockSpec((1, tn), lambda b_, i, n: (0, n)),
        ],
        out_specs=pl.BlockSpec((1, tr, tn), lambda b_, i, n: (b_, i, n)),
        out_shape=jax.ShapeDtypeStruct((B, T, N), out_dtype),
        scratch_shapes=[pltpu.VMEM((tr, D), jnp.bfloat16)],
        compiler_params=pltpu.CompilerParams(
            dimension_semantics=("parallel", "parallel", "arbitrary"),
            vmem_limit_bytes=_VMEM_LIMIT),
        cost_estimate=cost,
    )(x, shift.reshape(B, 1, D), scale.reshape(B, 1, D), w, b.reshape(1, N))


# ----------------------------------------------------------------------------
# Fused matmul + bias + gate * (.) + residual add (K-tiled with accumulator)
#   out = res + gate * (h @ w + b)                      (B,T,K) -> (B,T,D)
# ----------------------------------------------------------------------------
def _mm_gate_res_kernel(h_ref, w_ref, b_ref, g_ref, r_ref, o_ref, acc_ref):
    k = pl.program_id(2)

    @pl.when(k == 0)
    def _():
        acc_ref[...] = jnp.zeros_like(acc_ref)

    acc_ref[...] += jnp.dot(h_ref[0], w_ref[...],
                            preferred_element_type=jnp.float32)

    @pl.when(k == pl.num_programs(2) - 1)
    def _():
        y = acc_ref[...] + b_ref[...]
        o_ref[0] = (r_ref[0] + g_ref[0] * y).astype(o_ref.dtype)


def pallas_matmul_gate_residual(h, w, b, gate, res, tr=256, tk=512):
    B, T, K = h.shape
    _, D = w.shape
    tr, tk = _tile(T, tr), _tile(K, tk)
    grid = (B, T // tr, K // tk)
    cost = pl.CostEstimate(
        flops=2 * B * T * K * D,
        transcendentals=0,
        bytes_accessed=int(B * T * K * h.dtype.itemsize + K * D * w.dtype.itemsize
                           + 2 * B * T * D * 4))
    return pl.pallas_call(
        _mm_gate_res_kernel,
        grid=grid,
        in_specs=[
            pl.BlockSpec((1, tr, tk), lambda b_, i, k: (b_, i, k)),
            pl.BlockSpec((tk, D), lambda b_, i, k: (k, 0)),
            pl.BlockSpec((1, D), lambda b_, i, k: (0, 0)),
            pl.BlockSpec((1, 1, D), lambda b_, i, k: (b_, 0, 0)),
            pl.BlockSpec((1, tr, D), lambda b_, i, k: (b_, i, 0)),
        ],
        out_specs=pl.BlockSpec((1, tr, D), lambda b_, i, k: (b_, i, 0)),
        out_shape=jax.ShapeDtypeStruct((B, T, D), jnp.float32),
        scratch_shapes=[pltpu.VMEM((tr, D), jnp.float32)],
        compiler_params=pltpu.CompilerParams(
            dimension_semantics=("parallel", "parallel", "arbitrary"),
            vmem_limit_bytes=_VMEM_LIMIT),
        cost_estimate=cost,
    )(h, w, b.reshape(1, D), gate.reshape(B, 1, D), res)


# ----------------------------------------------------------------------------
# Fused multi-head attention: consumes packed qkv (B,T,3D), emits (B,T,D).
# Each head's result is written directly into its output slice (no concat).
# Grouped path: (batch, head-group, q-tile) grid, 128-lane-aligned qkv slabs.
# ----------------------------------------------------------------------------
def _attn_group_kernel(q_ref, k_ref, v_ref, o_ref, *, heads, head_dim, scale):
    q = q_ref[0]                                       # (tq, W) bf16
    k = k_ref[0]                                       # (T,  W) bf16
    v = v_ref[0]                                       # (T,  W) bf16
    for h in range(heads):                             # static unroll over group heads
        sl = slice(h * head_dim, (h + 1) * head_dim)
        s = jax.lax.dot_general(q[:, sl], k[:, sl], (((1,), (1,)), ((), ())),
                                preferred_element_type=jnp.float32) * scale
        s = s - jnp.max(s, axis=-1, keepdims=True)
        p = jnp.exp(s)
        p = p * pl.reciprocal(jnp.sum(p, axis=-1, keepdims=True), approx=True)
        o_ref[0, :, sl] = jnp.dot(p.astype(jnp.bfloat16), v[:, sl],
                                  preferred_element_type=jnp.float32
                                  ).astype(o_ref.dtype)


def _attn_full_kernel(qkv_ref, o_ref, *, num_heads, head_dim, scale):
    qkv = qkv_ref[0]                                   # (T, 3D) bf16
    D = num_heads * head_dim
    for h in range(num_heads):                         # static unroll over heads
        q = qkv[:, h * head_dim:(h + 1) * head_dim]
        k = qkv[:, D + h * head_dim:D + (h + 1) * head_dim]
        v = qkv[:, 2 * D + h * head_dim:2 * D + (h + 1) * head_dim]
        s = jax.lax.dot_general(q, k, (((1,), (1,)), ((), ())),
                                preferred_element_type=jnp.float32) * scale
        s = s - jnp.max(s, axis=-1, keepdims=True)
        p = jnp.exp(s)
        p = p * pl.reciprocal(jnp.sum(p, axis=-1, keepdims=True), approx=True)
        o_ref[0, :, h * head_dim:(h + 1) * head_dim] = jnp.dot(
            p.astype(jnp.bfloat16), v,
            preferred_element_type=jnp.float32).astype(o_ref.dtype)


def pallas_attention(qkv, num_heads, tq=256):
    B, T, threeD = qkv.shape
    D = threeD // 3
    Dh = D // num_heads
    scale = 1.0 / math.sqrt(Dh)

    # Pack heads into 128-lane-wide groups when possible (e.g. 2 heads of dim 64):
    # lane-aligned qkv DMA slabs, VMEM bounded at O(tq*T), parallel 3-D grid.
    if Dh % 128 == 0:
        hpg = 1
    elif 128 % Dh == 0 and num_heads % (128 // Dh) == 0:
        hpg = 128 // Dh
    else:
        hpg = 0                                        # no aligned grouping possible

    if hpg:
        W = hpg * Dh
        n_groups = num_heads // hpg
        tq = _tile(T, tq)
        return pl.pallas_call(
            functools.partial(_attn_group_kernel, heads=hpg, head_dim=Dh,
                              scale=scale),
            grid=(B, n_groups, T // tq),
            in_specs=[
                pl.BlockSpec((1, tq, W), lambda b_, g, i: (b_, i, g)),
                pl.BlockSpec((1, T, W), lambda b_, g, i: (b_, 0, n_groups + g)),
                pl.BlockSpec((1, T, W), lambda b_, g, i: (b_, 0, 2 * n_groups + g)),
            ],
            out_specs=pl.BlockSpec((1, tq, W), lambda b_, g, i: (b_, i, g)),
            out_shape=jax.ShapeDtypeStruct((B, T, D), jnp.bfloat16),
            compiler_params=pltpu.CompilerParams(
                dimension_semantics=("parallel", "parallel", "parallel"),
                vmem_limit_bytes=_VMEM_LIMIT),
        )(qkv, qkv, qkv)

    # Fallback (toy / non-128-alignable head widths): whole sequence per batch,
    # full-extent blocks, still with per-head direct output-slice writes.
    # TODO(synk): add q-tiling (flash-style) to this fallback for very long T.
    return pl.pallas_call(
        functools.partial(_attn_full_kernel, num_heads=num_heads, head_dim=Dh,
                          scale=scale),
        grid=(B,),
        in_specs=[pl.BlockSpec((1, T, threeD), lambda b_: (b_, 0, 0))],
        out_specs=pl.BlockSpec((1, T, D), lambda b_: (b_, 0, 0)),
        out_shape=jax.ShapeDtypeStruct((B, T, D), jnp.bfloat16),
        compiler_params=pltpu.CompilerParams(
            dimension_semantics=("parallel",),
            vmem_limit_bytes=_VMEM_LIMIT),
    )(qkv)


# ----------------------------------------------------------------------------
# Fused final LayerNorm (no affine) + token mean-pool: (B,T,D) -> (B,D)
# ----------------------------------------------------------------------------
def _ln_pool_kernel(x_ref, o_ref, acc_ref, *, eps, inv_t):
    i = pl.program_id(1)

    @pl.when(i == 0)
    def _():
        acc_ref[...] = jnp.zeros_like(acc_ref)

    x = x_ref[0]                                       # (tr, D) f32
    mu = jnp.mean(x, axis=-1, keepdims=True)
    var = jnp.mean(jnp.square(x - mu), axis=-1, keepdims=True)
    xn = (x - mu) * jax.lax.rsqrt(var + eps)
    acc_ref[...] += jnp.sum(xn, axis=0, keepdims=True)

    @pl.when(i == pl.num_programs(1) - 1)
    def _():
        o_ref[0] = (acc_ref[...] * inv_t).astype(o_ref.dtype)


def pallas_layernorm_meanpool(x, eps=1e-6, tr=256):
    B, T, D = x.shape
    tr = _tile(T, tr)
    out = pl.pallas_call(
        functools.partial(_ln_pool_kernel, eps=eps, inv_t=1.0 / T),
        grid=(B, T // tr),
        in_specs=[pl.BlockSpec((1, tr, D), lambda b_, i: (b_, i, 0))],
        out_specs=pl.BlockSpec((1, 1, D), lambda b_, i: (b_, 0, 0)),
        out_shape=jax.ShapeDtypeStruct((B, 1, D), jnp.float32),
        scratch_shapes=[pltpu.VMEM((1, D), jnp.float32)],
        compiler_params=pltpu.CompilerParams(
            dimension_semantics=("parallel", "arbitrary"),
            vmem_limit_bytes=_VMEM_LIMIT),
    )(x)
    return out[:, 0, :]


# ----------------------------------------------------------------------------
# Fused classification head: Lin(D,1024)-GELU-Lin(1024,512)-GELU-Lin(512,C)
# ----------------------------------------------------------------------------
def _head_kernel(z_ref, w1_ref, b1_ref, w2_ref, b2_ref, w3_ref, b3_ref, o_ref):
    h = jnp.dot(z_ref[...].astype(jnp.bfloat16), w1_ref[...],
                preferred_element_type=jnp.float32) + b1_ref[...]
    h = _apply_act(h, "gelu_erf")
    h = jnp.dot(h.astype(jnp.bfloat16), w2_ref[...],
                preferred_element_type=jnp.float32) + b2_ref[...]
    h = _apply_act(h, "gelu_erf")
    o_ref[...] = (jnp.dot(h.astype(jnp.bfloat16), w3_ref[...],
                          preferred_element_type=jnp.float32)
                  + b3_ref[...]).astype(o_ref.dtype)


def pallas_head(z, w1, b1, w2, b2, w3, b3, tm=256):
    M, D = z.shape
    H1, H2, C = w1.shape[1], w2.shape[1], w3.shape[1]
    tm = _tile(M, tm)
    return pl.pallas_call(
        _head_kernel,
        grid=(M // tm,),
        in_specs=[
            pl.BlockSpec((tm, D), lambda i: (i, 0)),
            pl.BlockSpec((D, H1), lambda i: (0, 0)),
            pl.BlockSpec((1, H1), lambda i: (0, 0)),
            pl.BlockSpec((H1, H2), lambda i: (0, 0)),
            pl.BlockSpec((1, H2), lambda i: (0, 0)),
            pl.BlockSpec((H2, C), lambda i: (0, 0)),
            pl.BlockSpec((1, C), lambda i: (0, 0)),
        ],
        out_specs=pl.BlockSpec((tm, C), lambda i: (i, 0)),
        out_shape=jax.ShapeDtypeStruct((M, C), jnp.float32),
        compiler_params=pltpu.CompilerParams(
            dimension_semantics=("parallel",),
            vmem_limit_bytes=_VMEM_LIMIT),
    )(z, w1, b1.reshape(1, H1), w2, b2.reshape(1, H2), w3, b3.reshape(1, C))


# ----------------------------------------------------------------------------
# Backbone + head (glue in plain JAX, compute in Pallas)
# ----------------------------------------------------------------------------
def timestep_embedding(t, dim, max_period=10000.0):
    half = dim // 2
    freqs = jnp.exp(
        -math.log(max_period) * jnp.arange(half, dtype=jnp.float32) / half)
    args = t.astype(jnp.float32)[:, None] * freqs[None, :]
    return jnp.concatenate([jnp.cos(args), jnp.sin(args)], axis=-1)


def sincos_pos_embed(T, D):
    # TODO(synk): DiT uses a 2D (grid_h, grid_w) sincos embedding; this 1D variant
    #             only matches the synthetic weights used here.
    pos = jnp.arange(T, dtype=jnp.float32)[:, None]
    omega = 1.0 / (10000.0 ** (jnp.arange(D // 2, dtype=jnp.float32) / (D // 2)))
    out = pos * omega[None, :]
    return jnp.concatenate([jnp.sin(out), jnp.cos(out)], axis=-1)   # (T, D)


def dit_block(x, mod, blk, num_heads):
    (shift_msa, scale_msa, gate_msa,
     shift_mlp, scale_mlp, gate_mlp) = jnp.split(mod, 6, axis=-1)

    # --- attention branch: LN+mod+QKV  ->  attention  ->  proj + gated residual ---
    qkv = pallas_ln_mod_matmul(x, shift_msa, scale_msa,
                               blk["qkv_w"], blk["qkv_b"],
                               out_dtype=jnp.bfloat16)
    a = pallas_attention(qkv, num_heads)
    x = pallas_matmul_gate_residual(a, blk["proj_w"], blk["proj_b"], gate_msa, x)

    # --- MLP branch: LN+mod+fc1+GELU(tanh)  ->  fc2 + gated residual ---
    h = pallas_ln_mod_matmul(x, shift_mlp, scale_mlp,
                             blk["fc1_w"], blk["fc1_b"],
                             act="gelu_tanh", out_dtype=jnp.bfloat16)
    x = pallas_matmul_gate_residual(h, blk["fc2_w"], blk["fc2_b"], gate_mlp, x)
    return x


def dit_backbone(params, x, t):
    cfg = params["cfg"]
    B, C, H, W = x.shape
    p, D = cfg["patch"], cfg["embed_dim"]
    Hp, Wp = H // p, W // p
    T = Hp * Wp

    # PatchEmbed: Conv2d(C, D, kernel=p, stride=p) == matmul over flattened patches
    xp = x.reshape(B, C, Hp, p, Wp, p)
    xp = xp.transpose(0, 2, 4, 1, 3, 5).reshape(B * T, C * p * p)
    tok = pallas_linear(xp, params["patch_w"], params["patch_b"]).reshape(B, T, D)
    tok = tok + params["pos_embed"][None, :, :]

    # TimestepEmbedder: sinusoidal -> Linear -> SiLU -> Linear
    temb = timestep_embedding(t, cfg["freq_dim"])
    c = pallas_linear(temb, params["t_w1"], params["t_b1"], act="silu")
    c = pallas_linear(c, params["t_w2"], params["t_b2"])
    c_silu = jax.nn.silu(c)              # shared adaLN input activation (tiny)

    # All blocks' adaLN modulations (Sequential(SiLU, Linear(D, 6D))) in ONE matmul:
    # M=B is tiny, so batching N across blocks amortizes launch/grid-step overhead.
    mod_all = pallas_linear(c_silu, params["adaln_w_all"], params["adaln_b_all"])

    xseq = tok
    for j, blk in enumerate(params["blocks"]):
        mod = mod_all[:, j * 6 * D:(j + 1) * 6 * D]
        xseq = dit_block(xseq, mod, blk, cfg["num_heads"])

    # final LayerNorm + token mean-pool fused -> (B, embed_dim) features
    # TODO(synk): DiT final_layer/unpatchify replaced by mean-pool (feature extractor).
    return pallas_layernorm_meanpool(xseq)


def model_forward(params, x, t, cls_only=True):
    z = dit_backbone(params, x, t)
    out = pallas_head(z, params["head_w1"], params["head_b1"],
                      params["head_w2"], params["head_b2"],
                      params["head_w3"], params["head_b3"])
    out = jnp.squeeze(out)
    if not cls_only:
        # TODO(synk): energy branch (autograd of logsumexp w.r.t. x) not implemented.
        raise NotImplementedError("cls_only=False requires grad through Pallas kernels")
    return out


# ----------------------------------------------------------------------------
# Deterministic parameter init (synthetic weights, not a checkpoint)
# ----------------------------------------------------------------------------
def init_params(key, *, in_channels, input_size, patch, embed_dim, num_heads,
                depth, mlp_ratio, freq_dim, num_class):
    keys = iter(jax.random.split(key, 8 + 16 * depth))

    def lin(fi, fo):
        w = 0.02 * jax.random.normal(next(keys), (fi, fo), jnp.float32)
        return w.astype(jnp.bfloat16), jnp.zeros((fo,), jnp.float32)

    T = (input_size // patch) ** 2
    hidden = int(embed_dim * mlp_ratio)

    params = {
        "cfg": dict(patch=patch, embed_dim=embed_dim, num_heads=num_heads,
                    freq_dim=freq_dim),
        "pos_embed": sincos_pos_embed(T, embed_dim),
    }
    params["patch_w"], params["patch_b"] = lin(in_channels * patch * patch, embed_dim)
    params["t_w1"], params["t_b1"] = lin(freq_dim, embed_dim)
    params["t_w2"], params["t_b2"] = lin(embed_dim, embed_dim)

    blocks, adaln_ws, adaln_bs = [], [], []
    for _ in range(depth):
        blk = {}
        aw, ab = lin(embed_dim, 6 * embed_dim)
        adaln_ws.append(aw)
        adaln_bs.append(ab)
        blk["qkv_w"], blk["qkv_b"] = lin(embed_dim, 3 * embed_dim)
        blk["proj_w"], blk["proj_b"] = lin(embed_dim, embed_dim)
        blk["fc1_w"], blk["fc1_b"] = lin(embed_dim, hidden)
        blk["fc2_w"], blk["fc2_b"] = lin(hidden, embed_dim)
        blocks.append(blk)
    params["blocks"] = blocks
    # Stacked adaLN weights: one (D, depth*6D) matmul for the whole network.
    params["adaln_w_all"] = jnp.concatenate(adaln_ws, axis=1)
    params["adaln_b_all"] = jnp.concatenate(adaln_bs, axis=0)

    params["head_w1"], params["head_b1"] = lin(embed_dim, 1024)
    params["head_w2"], params["head_b2"] = lin(1024, 512)
    params["head_w3"], params["head_b3"] = lin(512, num_class)
    return params


# ----------------------------------------------------------------------------
if __name__ == "__main__":
    # small shapes consistent with Model(args, input_size, in_channels, num_class)
    B, C, HW = 2, 4, 16
    num_class = 10

    key = jax.random.PRNGKey(0)
    kx, kt = jax.random.split(key)
    x = jax.random.normal(kx, (B, C, HW, HW), jnp.float32)          # NCHW like PyTorch
    t = jax.random.randint(kt, (B,), 0, 1000).astype(jnp.float32)   # diffusion timesteps

    params = init_params(jax.random.PRNGKey(42),
                         in_channels=C, input_size=HW, patch=4,
                         embed_dim=32, num_heads=4, depth=2, mlp_ratio=4,
                         freq_dim=256, num_class=num_class)

    out = model_forward(params, x, t, cls_only=True)
    out = jax.block_until_ready(out)
    assert out.shape == (B, num_class), out.shape
    assert bool(jnp.all(jnp.isfinite(out)))
    print("KERNEL_OK")
</pallas_src>

<mosaic_0001>
module attributes {stable_mosaic.version = 11 : i64} {
  func.func @_linear_kernel(%arg0: i32, %arg1: i32, %arg2: i32, %arg3: memref<32x64xf32, #tpu.memory_space<vmem>>, %arg4: memref<64x32xbf16, #tpu.memory_space<vmem>>, %arg5: memref<1x32xf32, #tpu.memory_space<vmem>>, %arg6: memref<32x32xf32, #tpu.memory_space<vmem>>, %arg7: memref<32x32xf32, #tpu.memory_space<vmem>>) attributes {dimension_semantics = [#tpu.dimension_semantics<parallel>, #tpu.dimension_semantics<parallel>, #tpu.dimension_semantics<arbitrary>], iteration_bounds = array<i64: 1, 1, 1>, scalar_prefetch = 0 : i64, scratch_operands = 1 : i64, tpu.core_type = #tpu.core_type<tc>, window_params = [{transform_indices = @transform_0, window_bounds = array<i64: 32, 64>}, {transform_indices = @transform_1, window_bounds = array<i64: 64, 32>}, {transform_indices = @transform_2, window_bounds = array<i64: 1, 32>}, {transform_indices = @transform_3, window_bounds = array<i64: 32, 32>}]} {
    %c0_i32 = arith.constant 0 : i32
    %0 = arith.cmpi eq, %arg2, %c0_i32 : i32
    %1 = arith.extui %0 : i1 to i32
    %c0_i32_0 = arith.constant 0 : i32
    %2 = arith.cmpi ne, %1, %c0_i32_0 : i32
    scf.if %2 {
      %cst_10 = arith.constant 0.000000e+00 : f32
      %13 = vector.broadcast %cst_10 : f32 to vector<32x32xf32>
      %c0_11 = arith.constant 0 : index
      %c0_12 = arith.constant 0 : index
      %14 = vector.load %arg7[%c0_11, %c0_12] : memref<32x32xf32, #tpu.memory_space<vmem>>, vector<32x32xf32>
      tpu.vector_store %arg7[%c0_11, %c0_12], %13 {strides = array<i32>} : memref<32x32xf32, #tpu.memory_space<vmem>>, vector<32x32xf32>,
    } else {
    }
    %c0 = arith.constant 0 : index
    %c0_1 = arith.constant 0 : index
    %3 = vector.load %arg7[%c0, %c0_1] : memref<32x32xf32, #tpu.memory_space<vmem>>, vector<32x32xf32>
    %c0_2 = arith.constant 0 : index
    %c0_3 = arith.constant 0 : index
    %4 = vector.load %arg3[%c0_2, %c0_3] : memref<32x64xf32, #tpu.memory_space<vmem>>, vector<32x64xf32>
    %5 = arith.truncf %4 : vector<32x64xf32> to vector<32x64xbf16>
    %c0_4 = arith.constant 0 : index
    %c0_5 = arith.constant 0 : index
    %6 = vector.load %arg4[%c0_4, %c0_5] : memref<64x32xbf16, #tpu.memory_space<vmem>>, vector<64x32xbf16>
    %cst = arith.constant dense<0.000000e+00> : vector<32x32xf32>
    %7 = tpu.matmul %5, %6, %cst {dimension_numbers = #tpu.dot_dimension_numbers<[1], [0], [0], [1], [0, 0, 1, 1], [], []>} : vector<32x64xbf16>, vector<64x32xbf16>, vector<32x32xf32> -> vector<32x32xf32>
    %8 = arith.addf %3, %7 : vector<32x32xf32>
    %c0_6 = arith.constant 0 : index
    %c0_7 = arith.constant 0 : index
    %9 = vector.load %arg7[%c0_6, %c0_7] : memref<32x32xf32, #tpu.memory_space<vmem>>, vector<32x32xf32>
    tpu.vector_store %arg7[%c0_6, %c0_7], %8 {strides = array<i32>} : memref<32x32xf32, #tpu.memory_space<vmem>>, vector<32x32xf32>,
    %c0_i32_8 = arith.constant 0 : i32
    %10 = arith.cmpi eq, %arg2, %c0_i32_8 : i32
    %11 = arith.extui %10 : i1 to i32
    %c0_i32_9 = arith.constant 0 : i32
    %12 = arith.cmpi ne, %11, %c0_i32_9 : i32
    scf.if %12 {
      %c0_10 = arith.constant 0 : index
      %c0_11 = arith.constant 0 : index
      %13 = vector.load %arg7[%c0_10, %c0_11] : memref<32x32xf32, #tpu.memory_space<vmem>>, vector<32x32xf32>
      %c0_12 = arith.constant 0 : index
      %c0_13 = arith.constant 0 : index
      %14 = vector.load %arg5[%c0_12, %c0_13] : memref<1x32xf32, #tpu.memory_space<vmem>>, vector<1x32xf32>
      %15 = vector.broadcast %14 : vector<1x32xf32> to vector<32x32xf32>
      %16 = arith.addf %13, %15 : vector<32x32xf32>
      %c0_14 = arith.constant 0 : index
      %c0_15 = arith.constant 0 : index
      %17 = vector.load %arg6[%c0_14, %c0_15] : memref<32x32xf32, #tpu.memory_space<vmem>>, vector<32x32xf32>
      tpu.vector_store %arg6[%c0_14, %c0_15], %16 {strides = array<i32>} : memref<32x32xf32, #tpu.memory_space<vmem>>, vector<32x32xf32>,
    } else {
    }
    return
  }
  func.func @transform_0(%arg0: i32, %arg1: i32, %arg2: i32) -> (i32, i32) {
    %c0_i32 = arith.constant 0 : i32
    return %arg0, %arg2 : i32, i32
  }
  func.func @transform_1(%arg0: i32, %arg1: i32, %arg2: i32) -> (i32, i32) {
    %c0_i32 = arith.constant 0 : i32
    return %arg2, %arg1 : i32, i32
  }
  func.func @transform_2(%arg0: i32, %arg1: i32, %arg2: i32) -> (i32, i32) {
    %c0_i32 = arith.constant 0 : i32
    %c0_i32_0 = arith.constant 0 : i32
    return %c0_i32, %arg1 : i32, i32
  }
  func.func @transform_3(%arg0: i32, %arg1: i32, %arg2: i32) -> (i32, i32) {
    %c0_i32 = arith.constant 0 : i32
    return %arg0, %arg1 : i32, i32
  }
}

</mosaic_0001>

<bundles_post_ra>
// kernel: tpu_custom_call.1
= control target key start
LH: loop header
LB: loop body
LE: loop exit
PB: predicated region body
PF: predicated region fallthrough
CT: control target
= control target key end

     0   :  { %vm20_vm0 = vcmask 261120   ;;  %v227_v2 = vmov 0.0   ;;  %vm67_vm1 = vcmask 523264   ;;  %s302_s0 = inlined_call_operand.vmem [shape: f32[32,64], index: 0, kind: input, shape index: {}]   ;;  %s303_s1 = inlined_call_operand.vmem [shape: bf16[64,32], index: 1, kind: input, shape index: {}]   ;;  %s304_s2 = inlined_call_operand.vmem [shape: f32[1,32], index: 2, kind: input, shape index: {}]   ;;  %s305_s3 = inlined_call_operand.hbm [shape: f32[32,32], index: 3, kind: output, shape index: {}]  }
   0x1   :  { %v199_v0 = vld [vmem:[%s303_s1] sm:$0xff]   ;;  %v200_v1 = vld [vmem:[%s303_s1 + $0x8] sm:$0xff]   ;;  %23 = vst.msk [vmem:[#allocation2 + $0x10] sm:$0xff] %vm20_vm0, %v227_v2  ;;  %21 = vst.msk [vmem:[#allocation2] sm:$0xff] %vm20_vm0, %v227_v2 }
   0x2   :  { %183 = vmatprep.subr.bf16.mxu0 %v199_v0  ;;  %22 = vst.msk [vmem:[#allocation2 + $0x8] sm:$0xff] %vm20_vm0, %v227_v2  ;;  %24 = vst.msk [vmem:[#allocation2 + $0x18] sm:$0xff] %vm20_vm0, %v227_v2  ;;  %v201_v3 = vld [vmem:[%s303_s1 + $0x10] sm:$0xff]   ;;  %v29_v4 = vld [vmem:[%s302_s0] sm:$0xff] }
   0x3   :  { %184 = vmatpush3.bf16.msra.mxu0 %v199_v0  ;;  %v30_v5 = vld [vmem:[%s302_s0 + $0x8] sm:$0xff] }
   0x4   :  { %185 = vmatprep.subr.bf16.mxu0 %v200_v1  ;;  %v33_v6 = vpack.c.bf16 %v30_v5, %v29_v4 }
   0x5   :  { %8 = vsyncpa [#allocation4], 0  ;;  %v202_v7 = vld [vmem:[%s303_s1 + $0x18] sm:$0xff]   ;;  %v31_v8 = vld [vmem:[%s302_s0 + $0x10] sm:$0xff]  ;;  %s228_s28 = smov [#allocation3]  }
   0x6   :  { %191 = vmatprep.mubr.msk.bf16.mxu0 %vm67_vm1, %v33_v6  ;;  %v32_v9 = vld [vmem:[%s302_s0 + $0x18] sm:$0xff]  ;;  %v176_v23 = vld [vmem:[%s304_s2] ss:$0 sm:$0xff]  ;;  %s159_s29 = sshll.u32 %s228_s28, 4  ;;  %s160_s29 = int_to_ptr.vmem [resolvable:$true] %s159_s29 }
   0x7   :  { %186 = vmatpush3.bf16.msra.mxu0 %v200_v1  ;;  %v34_v10 = vpack.c.bf16 %v32_v9, %v31_v8  ;;  %s203_s2 = scalar_lea.vmem %s160_s29, 512  ;;  %p208_p1 = scmp.lt.s32.totalorder %s160_s29, %s160_s29 }
   0x8   :  { %187 = vmatprep.subr.bf16.mxu0 %v201_v3  ;;  %v27_v11 = vld [vmem:[#allocation2 + $0x10] sm:$0xff]  ;;  %v25_v12 = vld [vmem:[#allocation2] sm:$0xff]  ;;  %p204_p0 = scmp.ne.s32.totalorder %s160_s29, %s203_s2  ;;  %p209_p2 = scmp.lt.s32.totalorder %s203_s2, %s203_s2 }
   0x9   :  { %v28_v14 = vld [vmem:[#allocation2 + $0x18] sm:$0xff]  ;;  %v26_v17 = vld [vmem:[#allocation2 + $0x8] sm:$0xff] }
   0xa   :  { %p210_p3 = por %p209_p2, %p208_p1 }
   0xb   :  { %188 = vmatpush3.bf16.msra.mxu0 %v201_v3 }
   0xc   :  { %189 = vmatprep.subr.bf16.mxu0 %v202_v7  ;;  %p211_p4 = pnand %p210_p3, %p204_p0 }
   0xf   :  { %190 = vmatpush3.bf16.msra.mxu0 %v202_v7 }
  0x12   :  { %192 = vmatmul.mubr.msk.bf16.vlgmr.msra.gmra.mrb[0].mxu0 %vm67_vm1, %v34_v10 }
  0xe5   :  { %v193_v13 = vpop.f32.mrb[0].mxu0 }
  0xe6   :  { %v125_v15 = vadd.f32 %v193_v13, %v27_v11  ;;  %v108_v16 = vpop.f32.mrb[1].mxu0 }
  0xe7   :  { %v123_v18 = vadd.f32 %v108_v16, %v25_v12  ;;  %v194_v19 = vpop.f32.mrb[2].mxu0 }
  0xe8   :  { %130 = vst.msk [vmem:[#allocation2 + $0x10] sm:$0xff] %vm20_vm0, %v125_v15  ;;  %v126_v20 = vadd.f32 %v194_v19, %v28_v14  ;;  %v111_v21 = vpop.f32.mrb[3].mxu0 }
  0xe9   :  { %128 = vst.msk [vmem:[#allocation2] sm:$0xff] %vm20_vm0, %v123_v18  ;;  %v124_v22 = vadd.f32 %v111_v21, %v26_v17 }
  0xea   :  { %131 = vst.msk [vmem:[#allocation2 + $0x18] sm:$0xff] %vm20_vm0, %v126_v20 }
  0xeb   :  { %129 = vst.msk [vmem:[#allocation2 + $0x8] sm:$0xff] %vm20_vm0, %v124_v22 }
  0xef   :  { %v137_v24 = vld [vmem:[#allocation2 + $0x10] sm:$0xff] }
  0xf0   :  { %v135_v25 = vld [vmem:[#allocation2] sm:$0xff]  ;;  %v148_v26 = vadd.f32 %v176_v23, %v137_v24 }
  0xf1   :  { %v138_v27 = vld [vmem:[#allocation2 + $0x18] sm:$0xff]  ;;  %v146_v28 = vadd.f32 %v176_v23, %v135_v25 }
  0xf2   :  { %v136_v29 = vld [vmem:[#allocation2 + $0x8] sm:$0xff]  ;;  %v149_v30 = vadd.f32 %v176_v23, %v138_v27  ;;  %152 = vst.msk [vmem:[#allocation3 + $0x10] sm:$0xff] %vm20_vm0, %v148_v26 }
  0xf3   :  { %v147_v31 = vadd.f32 %v176_v23, %v136_v29  ;;  %150 = vst.msk [vmem:[#allocation3] sm:$0xff] %vm20_vm0, %v146_v28 }
  0xf4   :  { %153 = vst.msk [vmem:[#allocation3 + $0x18] sm:$0xff] %vm20_vm0, %v149_v30 }
  0xf5   :  { %151 = vst.msk [vmem:[#allocation3 + $0x8] sm:$0xff] %vm20_vm0, %v147_v31 }
  0xf6   :  { %214 = shalt.err (!%p211_p4)
}
  0xf7   :  { %s215_s5 = scalar_lea.hbm %s305_s3, 512 }
  0xf8   :  { %p216_p5 = scmp.ne.s32.totalorder %s305_s3, %s215_s5  ;;  %p219_p6 = scmp.lt.u32.totalorder %s215_s5, %s305_s3 }
  0xfa   :  { %p221_p7 = pnand %p219_p6, %p216_p5 }
  0xfc   :  { %224 = shalt.err (!%p221_p7)
}
  0xfd   :  { %s229_s10 = smov 128   ;;  %s230_s11 = smov 8  }
  0xfe   :  { %165 = dma.vmem_to_hbm [thread:$0]  %s160_s29, 512, %s305_s3, [#allocation4], %s229_s10, %s229_s10, %s230_s11  }
  0xff   :  { %225 = dma.done.wait [#allocation4], 512  }
 0x100   :  { %226 = vsyncadd [#allocation4], 4294966784 }
 0x101   :  { %169 = vsyncpa [#allocation4], 1 }

</bundles_post_ra>
